<compile_context>
chip_gen: v7x
topology: tpu7x:2x2x1
jax: 0.10.0
libtpu: 0.0.40
codegen_flags: <defaults>
</compile_context>

<pallas_src>
import functools

import jax
import jax.numpy as jnp
from jax import lax
from jax.experimental import pallas as pl
from jax.experimental.pallas import tpu as pltpu

_LANE = 128
_NEG_FILL = -1e30  # bias for padded option lanes -> never the max, exp() underflows to 0


def _round_up(n: int, m: int) -> int:
    return ((n + m - 1) // m) * m


def hc_policy_kernel(x_ref, w1_ref, b1_ref, w2_ref, b2_ref, w3_ref, b3_ref,
                     out_ref, *, num_options: int):
    """One batch tile. Matmuls: bf16 operands, f32 accumulation on the MXU."""
    A = num_options

    # ---- MLP: Linear -> ReLU -> Linear -> ReLU -> Linear (padded, lane-dense) ----
    # x arrives as f32 straight from HBM; cast to bf16 here (VALU has slack) so the
    # wrapper needs no separate cast pass over x.
    x = x_ref[...].astype(jnp.bfloat16)                               # (TB, IN)
    h1 = jnp.dot(x, w1_ref[...], preferred_element_type=jnp.float32) + b1_ref[...]
    h1 = jnp.maximum(h1, 0.0).astype(jnp.bfloat16)                    # padded lanes stay 0
    h2 = jnp.dot(h1, w2_ref[...], preferred_element_type=jnp.float32) + b2_ref[...]
    h2 = jnp.maximum(h2, 0.0).astype(jnp.bfloat16)
    logits = jnp.dot(h2, w3_ref[...], preferred_element_type=jnp.float32) + b3_ref[...]
    # logits: (TB, 128) f32; lanes >= A carry a -1e30 bias.

    # ---- softmax statistics (numerically stable, f32 epilogue) ----
    m = jnp.max(logits, axis=-1, keepdims=True)                       # (TB, 1)
    denom = jnp.sum(jnp.exp(logits - m), axis=-1, keepdims=True)      # padded lanes: exp==0

    # Selected softmax value at the argmax is exp(0)/denom = 1/denom.
    probs_sel = pl.reciprocal(denom, approx=True) + 1e-7              # EUP slot, ~free
    # log_softmax at the argmax is -log(denom); the reference adds 1e-7 twice.
    logprobs_sel = 2e-7 - jnp.log(denom)

    # ---- argmax over logits (== argmax over probs); first index on ties ----
    TB, L = logits.shape
    lane = lax.broadcasted_iota(jnp.int32, (TB, L), 1)
    # NOTE: NaN logits make the mask all-false -> z == L (out of range); documented choice.
    z = jnp.min(jnp.where(logits >= m, lane, L), axis=-1, keepdims=True)  # (TB, 1) int32

    # ---- pack into one lane-dense slab: one unmasked 128-wide store ----
    packed = logits
    packed = jnp.where(lane == A,     z.astype(jnp.float32), packed)
    packed = jnp.where(lane == A + 1, probs_sel,             packed)
    packed = jnp.where(lane == A + 2, logprobs_sel,          packed)
    out_ref[...] = packed


def prepare_hc_policy_params(params, num_options_plus_one):
    """One-time layout plumbing: pad weights to lane-dense shapes and cast to bf16.

    Call once at init and reuse the result; keeps the per-forward launch graph minimal.
    """
    w1, b1, w2, b2, w3, b3 = params
    in_dim, fc_dim = w1.shape
    A = num_options_plus_one
    assert w3.shape[1] == A
    assert A + 3 <= _LANE, "option dim (+3 packed stats) must fit one 128-lane slab"

    FC = _round_up(fc_dim, _LANE)
    AP = _LANE
    w1p = jnp.pad(w1, ((0, 0), (0, FC - fc_dim))).astype(jnp.bfloat16)
    b1p = jnp.pad(b1.astype(jnp.float32), ((0, 0), (0, FC - fc_dim)))
    w2p = jnp.pad(w2, ((0, FC - fc_dim), (0, FC - fc_dim))).astype(jnp.bfloat16)
    b2p = jnp.pad(b2.astype(jnp.float32), ((0, 0), (0, FC - fc_dim)))
    w3p = jnp.pad(w3, ((0, FC - fc_dim), (0, AP - A))).astype(jnp.bfloat16)
    b3p = jnp.pad(b3.astype(jnp.float32), ((0, 0), (0, AP - A)),
                  constant_values=_NEG_FILL)
    weights = tuple(jax.device_put(w) for w in (w1p, b1p, w2p, b2p, w3p, b3p))
    return {"weights": weights, "in_dim": in_dim, "FC": FC, "AP": AP, "A": A}


def _choose_batch_tile(B: int, batch_tile: int) -> int:
    """Batch tile: multiple of 16 (bf16 sublane packing); >=2 grid steps when the
    batch allows it (keeps both v7x TensorCores busy); capped by batch_tile so
    single-TC v5e/v6e run few, large steps (sweep batch_tile in {512,1024,2048})."""
    Bp16 = _round_up(max(B, 1), 16)
    if Bp16 < 32:
        return Bp16
    return max(16, min(batch_tile, _round_up(pl.cdiv(Bp16, 2), 16)))


def hc_policy_forward(x, prepared, *, batch_tile=1024):
    """HC_Policy forward (deterministic=True path) in a single Pallas kernel."""
    B, in_dim = x.shape
    assert in_dim == prepared["in_dim"]
    A, FC, AP = prepared["A"], prepared["FC"], prepared["AP"]

    TB = _choose_batch_tile(B, batch_tile)
    Bp = _round_up(B, TB)
    xp = x if Bp == B else jnp.pad(x, ((0, Bp - B), (0, 0)))   # pad only when needed
    grid = (Bp // TB,)

    kernel = functools.partial(hc_policy_kernel, num_options=A)

    def build(single_buffer_weights: bool):
        def wspec(shape):
            # Weight/bias blocks never change (index_map is constant); a single VMEM
            # buffer is enough -- the default second buffer is dead VMEM + dead DMA.
            if single_buffer_weights:
                return pl.BlockSpec(shape, lambda i: (0, 0),
                                    pipeline_mode=pl.Buffered(1))
            return pl.BlockSpec(shape, lambda i: (0, 0))

        return pl.pallas_call(
            kernel,
            out_shape=jax.ShapeDtypeStruct((Bp, AP), jnp.float32),
            grid=grid,
            in_specs=[
                pl.BlockSpec((TB, in_dim), lambda i: (i, 0)),   # x tile (f32)
                wspec((in_dim, FC)), wspec((1, FC)),            # w1, b1
                wspec((FC, FC)),     wspec((1, FC)),            # w2, b2
                wspec((FC, AP)),     wspec((1, AP)),            # w3, b3
            ],
            out_specs=pl.BlockSpec((TB, AP), lambda i: (i, 0)),
            compiler_params=pltpu.CompilerParams(
                dimension_semantics=("parallel",)),             # shards steps across TCs
        )

    args = (xp,) + prepared["weights"]
    try:
        packed = build(True)(*args)
    except Exception:
        # Fallback if this JAX build rejects single-buffered (Buffered(1)) BlockSpecs.
        packed = build(False)(*args)

    packed = packed[:B]
    logits = packed[:, :A]
    z = packed[:, A].astype(jnp.int32)                          # (B,), like torch.argmax(..., -1)
    probs_sel = packed[:, A + 1:A + 2]
    logprobs_sel = packed[:, A + 2:A + 3]
    # TODO(synk): stochastic sampling path (torch.distributions.Categorical.sample) and the
    # returned `dist` object have no Pallas equivalent; only deterministic=True is implemented.
    return z, {"logits": logits, "probs": probs_sel, "logprobs": logprobs_sel}


def init_params(key, input_dim, fc_dim, num_options_plus_one):
    k1, k2, k3 = jax.random.split(key, 3)
    s1 = 1.0 / jnp.sqrt(input_dim)
    s2 = 1.0 / jnp.sqrt(fc_dim)
    w1 = jax.random.uniform(k1, (input_dim, fc_dim), jnp.float32, -s1, s1)
    b1 = jnp.zeros((1, fc_dim), jnp.float32)
    w2 = jax.random.uniform(k2, (fc_dim, fc_dim), jnp.float32, -s2, s2)
    b2 = jnp.zeros((1, fc_dim), jnp.float32)
    w3 = jax.random.uniform(k3, (fc_dim, num_options_plus_one), jnp.float32, -s2, s2)
    b3 = jnp.zeros((1, num_options_plus_one), jnp.float32)
    return (w1, b1, w2, b2, w3, b3)


if __name__ == "__main__":
    key = jax.random.PRNGKey(0)
    kx, kp = jax.random.split(key)

    B, input_dim, fc_dim, num_options = 8, 32, 32, 7
    A = num_options + 1  # HC_Policy adds the extra option internally

    x = jax.random.normal(kx, (B, input_dim), jnp.float32)
    params = init_params(kp, input_dim, fc_dim, A)
    prepared = prepare_hc_policy_params(params, A)   # one-time padding/casting

    z, out = hc_policy_forward(x, prepared)
    jax.block_until_ready((z, out["logits"], out["probs"], out["logprobs"]))

    # ---- reference with the same bf16-operand / f32-accumulate matmul precision ----
    w1, b1, w2, b2, w3, b3 = params
    bf = jnp.bfloat16
    h1 = jnp.maximum(jnp.dot(x.astype(bf), w1.astype(bf),
                             preferred_element_type=jnp.float32) + b1, 0.0)
    h2 = jnp.maximum(jnp.dot(h1.astype(bf), w2.astype(bf),
                             preferred_element_type=jnp.float32) + b2, 0.0)
    ref_logits = jnp.dot(h2.astype(bf), w3.astype(bf),
                         preferred_element_type=jnp.float32) + b3
    ref_probs = jax.nn.softmax(ref_logits, axis=-1) + 1e-7
    ref_logprobs = jax.nn.log_softmax(ref_logits, axis=-1) + 1e-7
    ref_z = jnp.argmax(ref_probs, axis=-1)
    ref_p_sel = jnp.take_along_axis(ref_probs, ref_z[:, None], axis=-1)
    ref_lp_sel = jnp.take_along_axis(ref_logprobs, ref_z[:, None], axis=-1) + 1e-7

    assert jnp.all(z == ref_z)
    assert jnp.allclose(out["logits"], ref_logits, atol=1e-4, rtol=1e-4)
    # approx reciprocal (EUP) -> slightly looser tolerance on the selected probability
    assert jnp.allclose(out["probs"], ref_p_sel, atol=1e-3, rtol=5e-3)
    assert jnp.allclose(out["logprobs"], ref_lp_sel, atol=1e-4, rtol=1e-4)

    print("KERNEL_OK")
</pallas_src>

<mosaic_0001>
module attributes {stable_mosaic.version = 11 : i64} {
  func.func @hc_policy_kernel(%arg0: i32, %arg1: memref<16x32xf32, #tpu.memory_space<vmem>>, %arg2: memref<32x128xbf16, #tpu.memory_space<vmem>>, %arg3: memref<1x128xf32, #tpu.memory_space<vmem>>, %arg4: memref<128x128xbf16, #tpu.memory_space<vmem>>, %arg5: memref<1x128xf32, #tpu.memory_space<vmem>>, %arg6: memref<128x128xbf16, #tpu.memory_space<vmem>>, %arg7: memref<1x128xf32, #tpu.memory_space<vmem>>, %arg8: memref<16x128xf32, #tpu.memory_space<vmem>>) attributes {dimension_semantics = [#tpu.dimension_semantics<parallel>], iteration_bounds = array<i64: 1>, scalar_prefetch = 0 : i64, scratch_operands = 0 : i64, tpu.core_type = #tpu.core_type<tc>, window_params = [{transform_indices = @transform_0, window_bounds = array<i64: 16, 32>}, {pipeline_mode = #tpu.pipeline_mode<synchronous>, transform_indices = @transform_1, window_bounds = array<i64: 32, 128>}, {pipeline_mode = #tpu.pipeline_mode<synchronous>, transform_indices = @transform_2, window_bounds = array<i64: 1, 128>}, {pipeline_mode = #tpu.pipeline_mode<synchronous>, transform_indices = @transform_3, window_bounds = array<i64: 128, 128>}, {pipeline_mode = #tpu.pipeline_mode<synchronous>, transform_indices = @transform_4, window_bounds = array<i64: 1, 128>}, {pipeline_mode = #tpu.pipeline_mode<synchronous>, transform_indices = @transform_5, window_bounds = array<i64: 128, 128>}, {pipeline_mode = #tpu.pipeline_mode<synchronous>, transform_indices = @transform_6, window_bounds = array<i64: 1, 128>}, {transform_indices = @transform_7, window_bounds = array<i64: 16, 128>}]} {
    %c0 = arith.constant 0 : index
    %c0_0 = arith.constant 0 : index
    %0 = vector.load %arg1[%c0, %c0_0] : memref<16x32xf32, #tpu.memory_space<vmem>>, vector<16x32xf32>
    %1 = arith.truncf %0 : vector<16x32xf32> to vector<16x32xbf16>
    %c0_1 = arith.constant 0 : index
    %c0_2 = arith.constant 0 : index
    %2 = vector.load %arg2[%c0_1, %c0_2] : memref<32x128xbf16, #tpu.memory_space<vmem>>, vector<32x128xbf16>
    %cst = arith.constant dense<0.000000e+00> : vector<16x128xf32>
    %3 = tpu.matmul %1, %2, %cst {dimension_numbers = #tpu.dot_dimension_numbers<[1], [0], [0], [1], [0, 0, 1, 1], [], []>} : vector<16x32xbf16>, vector<32x128xbf16>, vector<16x128xf32> -> vector<16x128xf32>
    %c0_3 = arith.constant 0 : index
    %c0_4 = arith.constant 0 : index
    %4 = vector.load %arg3[%c0_3, %c0_4] : memref<1x128xf32, #tpu.memory_space<vmem>>, vector<1x128xf32>
    %5 = vector.broadcast %4 : vector<1x128xf32> to vector<16x128xf32>
    %6 = arith.addf %3, %5 : vector<16x128xf32>
    %cst_5 = arith.constant 0.000000e+00 : f32
    %7 = vector.broadcast %cst_5 : f32 to vector<16x128xf32>
    %8 = arith.maximumf %6, %7 : vector<16x128xf32>
    %9 = arith.truncf %8 : vector<16x128xf32> to vector<16x128xbf16>
    %c0_6 = arith.constant 0 : index
    %c0_7 = arith.constant 0 : index
    %10 = vector.load %arg4[%c0_6, %c0_7] : memref<128x128xbf16, #tpu.memory_space<vmem>>, vector<128x128xbf16>
    %cst_8 = arith.constant dense<0.000000e+00> : vector<16x128xf32>
    %11 = tpu.matmul %9, %10, %cst_8 {dimension_numbers = #tpu.dot_dimension_numbers<[1], [0], [0], [1], [0, 0, 1, 1], [], []>} : vector<16x128xbf16>, vector<128x128xbf16>, vector<16x128xf32> -> vector<16x128xf32>
    %c0_9 = arith.constant 0 : index
    %c0_10 = arith.constant 0 : index
    %12 = vector.load %arg5[%c0_9, %c0_10] : memref<1x128xf32, #tpu.memory_space<vmem>>, vector<1x128xf32>
    %13 = vector.broadcast %12 : vector<1x128xf32> to vector<16x128xf32>
    %14 = arith.addf %11, %13 : vector<16x128xf32>
    %cst_11 = arith.constant 0.000000e+00 : f32
    %15 = vector.broadcast %cst_11 : f32 to vector<16x128xf32>
    %16 = arith.maximumf %14, %15 : vector<16x128xf32>
    %17 = arith.truncf %16 : vector<16x128xf32> to vector<16x128xbf16>
    %c0_12 = arith.constant 0 : index
    %c0_13 = arith.constant 0 : index
    %18 = vector.load %arg6[%c0_12, %c0_13] : memref<128x128xbf16, #tpu.memory_space<vmem>>, vector<128x128xbf16>
    %cst_14 = arith.constant dense<0.000000e+00> : vector<16x128xf32>
    %19 = tpu.matmul %17, %18, %cst_14 {dimension_numbers = #tpu.dot_dimension_numbers<[1], [0], [0], [1], [0, 0, 1, 1], [], []>} : vector<16x128xbf16>, vector<128x128xbf16>, vector<16x128xf32> -> vector<16x128xf32>
    %c0_15 = arith.constant 0 : index
    %c0_16 = arith.constant 0 : index
    %20 = vector.load %arg7[%c0_15, %c0_16] : memref<1x128xf32, #tpu.memory_space<vmem>>, vector<1x128xf32>
    %21 = vector.broadcast %20 : vector<1x128xf32> to vector<16x128xf32>
    %22 = arith.addf %19, %21 : vector<16x128xf32>
    %cst_17 = arith.constant dense<0xFF800000> : vector<16xf32>
    %23 = vector.multi_reduction <maximumf>, %22, %cst_17 [1] : vector<16x128xf32> to vector<16xf32>
    %24 = vector.shape_cast %23 : vector<16xf32> to vector<16x1xf32>
    %25 = vector.broadcast %24 : vector<16x1xf32> to vector<16x128xf32>
    %26 = arith.subf %22, %25 : vector<16x128xf32>
    %27 = math.exp %26 : vector<16x128xf32>
    %cst_18 = arith.constant dense<0.000000e+00> : vector<16xf32>
    %28 = vector.multi_reduction <add>, %27, %cst_18 [1] : vector<16x128xf32> to vector<16xf32>
    %29 = vector.shape_cast %28 : vector<16xf32> to vector<16x1xf32>
    %30 = tpu.reciprocal %29 {approx = true} : vector<16x1xf32> -> vector<16x1xf32>
    %cst_19 = arith.constant 1.000000e-07 : f32
    %31 = vector.broadcast %cst_19 : f32 to vector<16x1xf32>
    %32 = arith.addf %30, %31 : vector<16x1xf32>
    %33 = math.log %29 : vector<16x1xf32>
    %cst_20 = arith.constant 2.000000e-07 : f32
    %34 = vector.broadcast %cst_20 : f32 to vector<16x1xf32>
    %35 = arith.subf %34, %33 : vector<16x1xf32>
    %36 = tpu.iota {dimensions = array<i32: 1>} : vector<16x128xi32>
    %37 = vector.broadcast %24 : vector<16x1xf32> to vector<16x128xf32>
    %38 = arith.cmpf oge, %22, %37 : vector<16x128xf32>
    %c128_i32 = arith.constant 128 : i32
    %39 = vector.broadcast %c128_i32 : i32 to vector<16x128xi32>
    %40 = arith.select %38, %36, %39 : vector<16x128xi1>, vector<16x128xi32>
    %cst_21 = arith.constant dense<2147483647> : vector<16xi32>
    %41 = vector.multi_reduction <minsi>, %40, %cst_21 [1] : vector<16x128xi32> to vector<16xi32>
    %42 = vector.shape_cast %41 : vector<16xi32> to vector<16x1xi32>
    %c8_i32 = arith.constant 8 : i32
    %43 = vector.broadcast %c8_i32 : i32 to vector<16x128xi32>
    %44 = arith.cmpi eq, %36, %43 : vector<16x128xi32>
    %45 = arith.sitofp %42 : vector<16x1xi32> to vector<16x1xf32>
    %46 = vector.shape_cast %45 : vector<16x1xf32> to vector<16x1xf32>
    %47 = vector.broadcast %46 : vector<16x1xf32> to vector<16x128xf32>
    %48 = arith.select %44, %47, %22 : vector<16x128xi1>, vector<16x128xf32>
    %c9_i32 = arith.constant 9 : i32
    %49 = vector.broadcast %c9_i32 : i32 to vector<16x128xi32>
    %50 = arith.cmpi eq, %36, %49 : vector<16x128xi32>
    %51 = vector.shape_cast %32 : vector<16x1xf32> to vector<16x1xf32>
    %52 = vector.broadcast %51 : vector<16x1xf32> to vector<16x128xf32>
    %53 = arith.select %50, %52, %48 : vector<16x128xi1>, vector<16x128xf32>
    %c10_i32 = arith.constant 10 : i32
    %54 = vector.broadcast %c10_i32 : i32 to vector<16x128xi32>
    %55 = arith.cmpi eq, %36, %54 : vector<16x128xi32>
    %56 = vector.shape_cast %35 : vector<16x1xf32> to vector<16x1xf32>
    %57 = vector.broadcast %56 : vector<16x1xf32> to vector<16x128xf32>
    %58 = arith.select %55, %57, %53 : vector<16x128xi1>, vector<16x128xf32>
    %c0_22 = arith.constant 0 : index
    %c0_23 = arith.constant 0 : index
    %59 = vector.load %arg8[%c0_22, %c0_23] : memref<16x128xf32, #tpu.memory_space<vmem>>, vector<16x128xf32>
    tpu.vector_store %arg8[%c0_22, %c0_23], %58 {strides = array<i32>} : memref<16x128xf32, #tpu.memory_space<vmem>>, vector<16x128xf32>,
    return
  }
  func.func @transform_0(%arg0: i32) -> (i32, i32) {
    %c0_i32 = arith.constant 0 : i32
    %c0_i32_0 = arith.constant 0 : i32
    return %arg0, %c0_i32 : i32, i32
  }
  func.func @transform_1(%arg0: i32) -> (i32, i32) {
    %c0_i32 = arith.constant 0 : i32
    %c0_i32_0 = arith.constant 0 : i32
    %c0_i32_1 = arith.constant 0 : i32
    return %c0_i32, %c0_i32_0 : i32, i32
  }
  func.func @transform_2(%arg0: i32) -> (i32, i32) {
    %c0_i32 = arith.constant 0 : i32
    %c0_i32_0 = arith.constant 0 : i32
    %c0_i32_1 = arith.constant 0 : i32
    return %c0_i32, %c0_i32_0 : i32, i32
  }
  func.func @transform_3(%arg0: i32) -> (i32, i32) {
    %c0_i32 = arith.constant 0 : i32
    %c0_i32_0 = arith.constant 0 : i32
    %c0_i32_1 = arith.constant 0 : i32
    return %c0_i32, %c0_i32_0 : i32, i32
  }
  func.func @transform_4(%arg0: i32) -> (i32, i32) {
    %c0_i32 = arith.constant 0 : i32
    %c0_i32_0 = arith.constant 0 : i32
    %c0_i32_1 = arith.constant 0 : i32
    return %c0_i32, %c0_i32_0 : i32, i32
  }
  func.func @transform_5(%arg0: i32) -> (i32, i32) {
    %c0_i32 = arith.constant 0 : i32
    %c0_i32_0 = arith.constant 0 : i32
    %c0_i32_1 = arith.constant 0 : i32
    return %c0_i32, %c0_i32_0 : i32, i32
  }
  func.func @transform_6(%arg0: i32) -> (i32, i32) {
    %c0_i32 = arith.constant 0 : i32
    %c0_i32_0 = arith.constant 0 : i32
    %c0_i32_1 = arith.constant 0 : i32
    return %c0_i32, %c0_i32_0 : i32, i32
  }
  func.func @transform_7(%arg0: i32) -> (i32, i32) {
    %c0_i32 = arith.constant 0 : i32
    %c0_i32_0 = arith.constant 0 : i32
    return %arg0, %c0_i32 : i32, i32
  }
}

module attributes {stable_mosaic.version = 11 : i64} {
  func.func @hc_policy_kernel(%arg0: i32, %arg1: memref<16x32xf32, #tpu.memory_space<vmem>>, %arg2: memref<32x128xbf16, #tpu.memory_space<vmem>>, %arg3: memref<1x128xf32, #tpu.memory_space<vmem>>, %arg4: memref<128x128xbf16, #tpu.memory_space<vmem>>, %arg5: memref<1x128xf32, #tpu.memory_space<vmem>>, %arg6: memref<128x128xbf16, #tpu.memory_space<vmem>>, %arg7: memref<1x128xf32, #tpu.memory_space<vmem>>, %arg8: memref<16x128xf32, #tpu.memory_space<vmem>>) attributes {dimension_semantics = [#tpu.dimension_semantics<parallel>], iteration_bounds = array<i64: 1>, scalar_prefetch = 0 : i64, scratch_operands = 0 : i64, tpu.core_type = #tpu.core_type<tc>, window_params = [{transform_indices = @transform_0, window_bounds = array<i64: 16, 32>}, {pipeline_mode = #tpu.pipeline_mode<synchronous>, transform_indices = @transform_1, window_bounds = array<i64: 32, 128>}, {pipeline_mode = #tpu.pipeline_mode<synchronous>, transform_indices = @transform_2, window_bounds = array<i64: 1, 128>}, {pipeline_mode = #tpu.pipeline_mode<synchronous>, transform_indices = @transform_3, window_bounds = array<i64: 128, 128>}, {pipeline_mode = #tpu.pipeline_mode<synchronous>, transform_indices = @transform_4, window_bounds = array<i64: 1, 128>}, {pipeline_mode = #tpu.pipeline_mode<synchronous>, transform_indices = @transform_5, window_bounds = array<i64: 128, 128>}, {pipeline_mode = #tpu.pipeline_mode<synchronous>, transform_indices = @transform_6, window_bounds = array<i64: 1, 128>}, {transform_indices = @transform_7, window_bounds = array<i64: 16, 128>}]} {
    %c0 = arith.constant 0 : index
    %c0_0 = arith.constant 0 : index
    %0 = vector.load %arg1[%c0, %c0_0] : memref<16x32xf32, #tpu.memory_space<vmem>>, vector<16x32xf32>
    %1 = arith.truncf %0 : vector<16x32xf32> to vector<16x32xbf16>
    %c0_1 = arith.constant 0 : index
    %c0_2 = arith.constant 0 : index
    %2 = vector.load %arg2[%c0_1, %c0_2] : memref<32x128xbf16, #tpu.memory_space<vmem>>, vector<32x128xbf16>
    %cst = arith.constant dense<0.000000e+00> : vector<16x128xf32>
    %3 = tpu.matmul %1, %2, %cst {dimension_numbers = #tpu.dot_dimension_numbers<[1], [0], [0], [1], [0, 0, 1, 1], [], []>} : vector<16x32xbf16>, vector<32x128xbf16>, vector<16x128xf32> -> vector<16x128xf32>
    %c0_3 = arith.constant 0 : index
    %c0_4 = arith.constant 0 : index
    %4 = vector.load %arg3[%c0_3, %c0_4] : memref<1x128xf32, #tpu.memory_space<vmem>>, vector<1x128xf32>
    %5 = vector.broadcast %4 : vector<1x128xf32> to vector<16x128xf32>
    %6 = arith.addf %3, %5 : vector<16x128xf32>
    %cst_5 = arith.constant 0.000000e+00 : f32
    %7 = vector.broadcast %cst_5 : f32 to vector<16x128xf32>
    %8 = arith.maximumf %6, %7 : vector<16x128xf32>
    %9 = arith.truncf %8 : vector<16x128xf32> to vector<16x128xbf16>
    %c0_6 = arith.constant 0 : index
    %c0_7 = arith.constant 0 : index
    %10 = vector.load %arg4[%c0_6, %c0_7] : memref<128x128xbf16, #tpu.memory_space<vmem>>, vector<128x128xbf16>
    %cst_8 = arith.constant dense<0.000000e+00> : vector<16x128xf32>
    %11 = tpu.matmul %9, %10, %cst_8 {dimension_numbers = #tpu.dot_dimension_numbers<[1], [0], [0], [1], [0, 0, 1, 1], [], []>} : vector<16x128xbf16>, vector<128x128xbf16>, vector<16x128xf32> -> vector<16x128xf32>
    %c0_9 = arith.constant 0 : index
    %c0_10 = arith.constant 0 : index
    %12 = vector.load %arg5[%c0_9, %c0_10] : memref<1x128xf32, #tpu.memory_space<vmem>>, vector<1x128xf32>
    %13 = vector.broadcast %12 : vector<1x128xf32> to vector<16x128xf32>
    %14 = arith.addf %11, %13 : vector<16x128xf32>
    %cst_11 = arith.constant 0.000000e+00 : f32
    %15 = vector.broadcast %cst_11 : f32 to vector<16x128xf32>
    %16 = arith.maximumf %14, %15 : vector<16x128xf32>
    %17 = arith.truncf %16 : vector<16x128xf32> to vector<16x128xbf16>
    %c0_12 = arith.constant 0 : index
    %c0_13 = arith.constant 0 : index
    %18 = vector.load %arg6[%c0_12, %c0_13] : memref<128x128xbf16, #tpu.memory_space<vmem>>, vector<128x128xbf16>
    %cst_14 = arith.constant dense<0.000000e+00> : vector<16x128xf32>
    %19 = tpu.matmul %17, %18, %cst_14 {dimension_numbers = #tpu.dot_dimension_numbers<[1], [0], [0], [1], [0, 0, 1, 1], [], []>} : vector<16x128xbf16>, vector<128x128xbf16>, vector<16x128xf32> -> vector<16x128xf32>
    %c0_15 = arith.constant 0 : index
    %c0_16 = arith.constant 0 : index
    %20 = vector.load %arg7[%c0_15, %c0_16] : memref<1x128xf32, #tpu.memory_space<vmem>>, vector<1x128xf32>
    %21 = vector.broadcast %20 : vector<1x128xf32> to vector<16x128xf32>
    %22 = arith.addf %19, %21 : vector<16x128xf32>
    %cst_17 = arith.constant dense<0xFF800000> : vector<16xf32>
    %23 = vector.multi_reduction <maximumf>, %22, %cst_17 [1] : vector<16x128xf32> to vector<16xf32>
    %24 = vector.shape_cast %23 : vector<16xf32> to vector<16x1xf32>
    %25 = vector.broadcast %24 : vector<16x1xf32> to vector<16x128xf32>
    %26 = arith.subf %22, %25 : vector<16x128xf32>
    %27 = math.exp %26 : vector<16x128xf32>
    %cst_18 = arith.constant dense<0.000000e+00> : vector<16xf32>
    %28 = vector.multi_reduction <add>, %27, %cst_18 [1] : vector<16x128xf32> to vector<16xf32>
    %29 = vector.shape_cast %28 : vector<16xf32> to vector<16x1xf32>
    %30 = tpu.reciprocal %29 {approx = true} : vector<16x1xf32> -> vector<16x1xf32>
    %cst_19 = arith.constant 1.000000e-07 : f32
    %31 = vector.broadcast %cst_19 : f32 to vector<16x1xf32>
    %32 = arith.addf %30, %31 : vector<16x1xf32>
    %33 = math.log %29 : vector<16x1xf32>
    %cst_20 = arith.constant 2.000000e-07 : f32
    %34 = vector.broadcast %cst_20 : f32 to vector<16x1xf32>
    %35 = arith.subf %34, %33 : vector<16x1xf32>
    %36 = tpu.iota {dimensions = array<i32: 1>} : vector<16x128xi32>
    %37 = vector.broadcast %24 : vector<16x1xf32> to vector<16x128xf32>
    %38 = arith.cmpf oge, %22, %37 : vector<16x128xf32>
    %c128_i32 = arith.constant 128 : i32
    %39 = vector.broadcast %c128_i32 : i32 to vector<16x128xi32>
    %40 = arith.select %38, %36, %39 : vector<16x128xi1>, vector<16x128xi32>
    %cst_21 = arith.constant dense<2147483647> : vector<16xi32>
    %41 = vector.multi_reduction <minsi>, %40, %cst_21 [1] : vector<16x128xi32> to vector<16xi32>
    %42 = vector.shape_cast %41 : vector<16xi32> to vector<16x1xi32>
    %c8_i32 = arith.constant 8 : i32
    %43 = vector.broadcast %c8_i32 : i32 to vector<16x128xi32>
    %44 = arith.cmpi eq, %36, %43 : vector<16x128xi32>
    %45 = arith.sitofp %42 : vector<16x1xi32> to vector<16x1xf32>
    %46 = vector.shape_cast %45 : vector<16x1xf32> to vector<16x1xf32>
    %47 = vector.broadcast %46 : vector<16x1xf32> to vector<16x128xf32>
    %48 = arith.select %44, %47, %22 : vector<16x128xi1>, vector<16x128xf32>
    %c9_i32 = arith.constant 9 : i32
    %49 = vector.broadcast %c9_i32 : i32 to vector<16x128xi32>
    %50 = arith.cmpi eq, %36, %49 : vector<16x128xi32>
    %51 = vector.shape_cast %32 : vector<16x1xf32> to vector<16x1xf32>
    %52 = vector.broadcast %51 : vector<16x1xf32> to vector<16x128xf32>
    %53 = arith.select %50, %52, %48 : vector<16x128xi1>, vector<16x128xf32>
    %c10_i32 = arith.constant 10 : i32
    %54 = vector.broadcast %c10_i32 : i32 to vector<16x128xi32>
    %55 = arith.cmpi eq, %36, %54 : vector<16x128xi32>
    %56 = vector.shape_cast %35 : vector<16x1xf32> to vector<16x1xf32>
    %57 = vector.broadcast %56 : vector<16x1xf32> to vector<16x128xf32>
    %58 = arith.select %55, %57, %53 : vector<16x128xi1>, vector<16x128xf32>
    %c0_22 = arith.constant 0 : index
    %c0_23 = arith.constant 0 : index
    %59 = vector.load %arg8[%c0_22, %c0_23] : memref<16x128xf32, #tpu.memory_space<vmem>>, vector<16x128xf32>
    tpu.vector_store %arg8[%c0_22, %c0_23], %58 {strides = array<i32>} : memref<16x128xf32, #tpu.memory_space<vmem>>, vector<16x128xf32>,
    return
  }
  func.func @transform_0(%arg0: i32) -> (i32, i32) {
    %c0_i32 = arith.constant 0 : i32
    %c0_i32_0 = arith.constant 0 : i32
    return %arg0, %c0_i32 : i32, i32
  }
  func.func @transform_1(%arg0: i32) -> (i32, i32) {
    %c0_i32 = arith.constant 0 : i32
    %c0_i32_0 = arith.constant 0 : i32
    %c0_i32_1 = arith.constant 0 : i32
    return %c0_i32, %c0_i32_0 : i32, i32
  }
  func.func @transform_2(%arg0: i32) -> (i32, i32) {
    %c0_i32 = arith.constant 0 : i32
    %c0_i32_0 = arith.constant 0 : i32
    %c0_i32_1 = arith.constant 0 : i32
    return %c0_i32, %c0_i32_0 : i32, i32
  }
  func.func @transform_3(%arg0: i32) -> (i32, i32) {
    %c0_i32 = arith.constant 0 : i32
    %c0_i32_0 = arith.constant 0 : i32
    %c0_i32_1 = arith.constant 0 : i32
    return %c0_i32, %c0_i32_0 : i32, i32
  }
  func.func @transform_4(%arg0: i32) -> (i32, i32) {
    %c0_i32 = arith.constant 0 : i32
    %c0_i32_0 = arith.constant 0 : i32
    %c0_i32_1 = arith.constant 0 : i32
    return %c0_i32, %c0_i32_0 : i32, i32
  }
  func.func @transform_5(%arg0: i32) -> (i32, i32) {
    %c0_i32 = arith.constant 0 : i32
    %c0_i32_0 = arith.constant 0 : i32
    %c0_i32_1 = arith.constant 0 : i32
    return %c0_i32, %c0_i32_0 : i32, i32
  }
  func.func @transform_6(%arg0: i32) -> (i32, i32) {
    %c0_i32 = arith.constant 0 : i32
    %c0_i32_0 = arith.constant 0 : i32
    %c0_i32_1 = arith.constant 0 : i32
    return %c0_i32, %c0_i32_0 : i32, i32
  }
  func.func @transform_7(%arg0: i32) -> (i32, i32) {
    %c0_i32 = arith.constant 0 : i32
    %c0_i32_0 = arith.constant 0 : i32
    return %arg0, %c0_i32 : i32, i32
  }
}

</mosaic_0001>

<bundles_post_ra>
// kernel: tpu_custom_call.1
= control target key start
LH: loop header
LB: loop body
LE: loop exit
PB: predicated region body
PF: predicated region fallthrough
CT: control target
= control target key end

     0   :  { %12 = vsyncpa [#allocation3], 0  ;;  %s921_s0 = inlined_call_operand.hbm [shape: f32[16,32], index: 0, kind: input, shape index: {}]   ;;  %s922_s1 = inlined_call_operand.hbm [shape: bf16[32,128], index: 1, kind: input, shape index: {}]   ;;  %s923_s2 = inlined_call_operand.vmem [shape: f32[1,128], index: 2, kind: input, shape index: {}]   ;;  %s924_s3 = inlined_call_operand.hbm [shape: bf16[128,128], index: 3, kind: input, shape index: {}]   ;;  %s925_s4 = inlined_call_operand.vmem [shape: f32[1,128], index: 4, kind: input, shape index: {}]   ;;  %s926_s5 = inlined_call_operand.hbm [shape: bf16[128,128], index: 5, kind: input, shape index: {}]   ;;  %s927_s6 = inlined_call_operand.vmem [shape: f32[1,128], index: 6, kind: input, shape index: {}]   ;;  %s928_s7 = inlined_call_operand.hbm [shape: f32[16,128], index: 7, kind: output, shape index: {}]  }
   0x1   :  { %13 = vsyncpa [#allocation6], 0 }
   0x2   :  { %14 = vsyncpa [#allocation9], 0 }
   0x3   :  { %15 = vsyncpa [#allocation4], 0  ;;  %s724_s24 = smov [#allocation5]   ;;  %s606_s28 = scalar_lea.hbm %s922_s1, 256 }
   0x4   :  { %s33_s25 = sshll.u32 %s724_s24, 4  ;;  %p607_p0 = scmp.ne.s32.totalorder %s922_s1, %s606_s28  ;;  %s34_s25 = int_to_ptr.vmem [resolvable:$true] %s33_s25 }
   0x5   :  { %p610_p1 = scmp.lt.u32.totalorder %s606_s28, %s922_s1 }
   0x7   :  { %p612_p2 = pnand %p610_p1, %p607_p0 }
   0x9   :  { %615 = shalt.err (!%p612_p2)
}
   0xa   :  { %s616_s10 = scalar_lea.vmem %s34_s25, 256  ;;  %p621_p4 = scmp.lt.s32.totalorder %s34_s25, %s34_s25 }
   0xb   :  { %p617_p3 = scmp.ne.s32.totalorder %s34_s25, %s616_s10  ;;  %p622_p5 = scmp.lt.s32.totalorder %s616_s10, %s616_s10 }
   0xd   :  { %p623_p6 = por %p622_p5, %p621_p4 }
   0xf   :  { %p624_p7 = pnand %p623_p6, %p617_p3 }
  0x11   :  { %627 = shalt.err (!%p624_p7)
}
  0x12   :  { %s725_s11 = smov 64   ;;  %s726_s12 = smov 4  }
  0x13   :  { %39 = dma.hbm_to_vmem [thread:$0]  %s922_s1, 256, %s34_s25, [#allocation6], %s725_s11, %s725_s11, %s726_s12  }
  0x14   :  { %s727_s15 = smov [#allocation2]   ;;  %s628_s19 = scalar_lea.hbm %s921_s0, 256 }
  0x15   :  { %s21_s16 = sshll.u32 %s727_s15, 4  ;;  %p629_p8 = scmp.ne.s32.totalorder %s921_s0, %s628_s19  ;;  %s22_s16 = int_to_ptr.vmem [resolvable:$true] %s21_s16 }
  0x16   :  { %p632_p9 = scmp.lt.u32.totalorder %s628_s19, %s921_s0 }
  0x18   :  { %p634_p10 = pnand %p632_p9, %p629_p8 }
  0x1a   :  { %637 = shalt.err (!%p634_p10)
}
  0x1b   :  { %s638_s24 = scalar_lea.vmem %s22_s16, 256  ;;  %p643_p12 = scmp.lt.s32.totalorder %s22_s16, %s22_s16 }
  0x1c   :  { %p639_p11 = scmp.ne.s32.totalorder %s22_s16, %s638_s24  ;;  %p644_p13 = scmp.lt.s32.totalorder %s638_s24, %s638_s24 }
  0x1e   :  { %p645_p0 = por %p644_p13, %p643_p12 }
  0x20   :  { %p646_p1 = pnand %p645_p0, %p639_p11 }
  0x22   :  { %649 = shalt.err (!%p646_p1)
}
  0x23   :  { %s728_s1 = smov 128   ;;  %s729_s25 = smov 8  }
  0x24   :  { %27 = dma.hbm_to_vmem [thread:$0]  %s921_s0, 256, %s22_s16, [#allocation3], %s728_s1, %s728_s1, %s729_s25  }
  0x25   :  { %s730_s28 = smov [#allocation7]   ;;  %s731_s30 = smov [#allocation8]  }
  0x26   :  { %s47_s29 = sshll.u32 %s730_s28, 4  ;;  %s61_s8 = sshll.u32 %s731_s30, 4  ;;  %s48_s29 = int_to_ptr.vmem [resolvable:$true] %s47_s29  ;;  %s805_s8 = int_to_ptr.vmem [resolvable:$true] %s61_s8 }
  0x27   :  { %s650_s13 = scalar_lea.hbm %s924_s3, 1024 }
  0x28   :  { %p651_p2 = scmp.ne.s32.totalorder %s924_s3, %s650_s13  ;;  %p654_p3 = scmp.lt.u32.totalorder %s650_s13, %s924_s3 }
  0x2a   :  { %p656_p4 = pnand %p654_p3, %p651_p2 }
  0x2c   :  { %659 = shalt.err (!%p656_p4)
}
  0x2d   :  { %s660_s0 = scalar_lea.vmem %s48_s29, 1024  ;;  %p665_p6 = scmp.lt.s32.totalorder %s48_s29, %s48_s29 }
  0x2e   :  { %p661_p5 = scmp.ne.s32.totalorder %s48_s29, %s660_s0  ;;  %p666_p7 = scmp.lt.s32.totalorder %s660_s0, %s660_s0 }
  0x30   :  { %p667_p8 = por %p666_p7, %p665_p6 }
  0x32   :  { %p668_p9 = pnand %p667_p8, %p661_p5 }
  0x34   :  { %671 = shalt.err (!%p668_p9)
}
  0x35   :  { %53 = dma.hbm_to_vmem [thread:$0]  %s924_s3, 1024, %s48_s29, [#allocation6], %s725_s11, %s725_s11, %s726_s12  }
  0x36   :  { %s672_s22 = scalar_lea.hbm %s926_s5, 1024 }
  0x37   :  { %p673_p10 = scmp.ne.s32.totalorder %s926_s5, %s672_s22  ;;  %p676_p11 = scmp.lt.u32.totalorder %s672_s22, %s926_s5 }
  0x39   :  { %p678_p12 = pnand %p676_p11, %p673_p10 }
  0x3b   :  { %681 = shalt.err (!%p678_p12)
}
  0x3c   :  { %s682_s28 = scalar_lea.vmem %s805_s8, 1024  ;;  %p687_p0 = scmp.lt.s32.totalorder %s805_s8, %s805_s8 }
  0x3d   :  { %p683_p13 = scmp.ne.s32.totalorder %s805_s8, %s682_s28  ;;  %p688_p1 = scmp.lt.s32.totalorder %s682_s28, %s682_s28 }
  0x3f   :  { %p689_p2 = por %p688_p1, %p687_p0 }
  0x41   :  { %p690_p3 = pnand %p689_p2, %p683_p13 }
  0x43   :  { %693 = shalt.err (!%p690_p3)
}
  0x44   :  { %67 = dma.hbm_to_vmem [thread:$0]  %s926_s5, 1024, %s805_s8, [#allocation9], %s725_s11, %s725_s11, %s726_s12  }
  0x45   :  { %716 = dma.done.wait [#allocation3], 256  }
  0x46   :  { %717 = vsyncadd [#allocation3], 4294967040 }
  0x47   :  { %718 = dma.done.wait [#allocation6], 1280  }
  0x48   :  { %719 = vsyncadd [#allocation6], 4294966016 }
  0x49   :  { %720 = dma.done.wait [#allocation9], 1024  }
  0x4a   :  { %721 = vsyncadd [#allocation9], 4294966272  ;;  %v732_v0 = vmov 0.0   ;;  %vm733_vm0 = vmmov 0   ;;  %v576_v1 = vld [vmem:[#allocation5] sm:$0xff]   ;;  %v577_v2 = vld [vmem:[#allocation5 + $0x8] sm:$0xff]   ;;  %v408_v49 = vlaneseq }
  0x4b   :  { %517 = vmatprep.subr.bf16.mxu0 %v732_v0  ;;  %521 = vmatprep.mubr.msk.bf16.mxu0 %vm733_vm0, %v732_v0  ;;  %v83_v3 = vld [vmem:[#allocation2] sm:$0xff]  ;;  %v84_v4 = vld [vmem:[#allocation2 + $0x8] sm:$0xff]  ;;  %vm109_vm1 = vcmask 261120   ;;  %v580_v8 = vld [vmem:[#allocation7 + $0x10] sm:$0xff]  }
  0x4c   :  { %525 = vmatprep.subr.bf16.mxu1 %v732_v0  ;;  %541 = vmatprep.mubr.msk.bf16.mxu1 %vm733_vm0, %v732_v0  ;;  %v578_v5 = vld [vmem:[#allocation7] sm:$0xff]   ;;  %v85_v6 = vpack.c.bf16 %v84_v4, %v83_v3  ;;  %v579_v7 = vld [vmem:[#allocation7 + $0x8] sm:$0xff]   ;;  %v581_v9 = vld [vmem:[#allocation7 + $0x18] sm:$0xff]   ;;  %v881_v50 = vand.u32 127, %v408_v49 }
  0x4d   :  { %518 = vmatpush3.bf16.msra.mxu0 %v576_v1  ;;  %526 = vmatpush3.bf16.msra.mxu1 %v578_v5  ;;  %v582_v10 = vld [vmem:[#allocation7 + $0x20] sm:$0xff]   ;;  %v583_v11 = vld [vmem:[#allocation7 + $0x28] sm:$0xff]   ;;  %v584_v12 = vld [vmem:[#allocation7 + $0x30] sm:$0xff]  }
  0x4e   :  { %519 = vmatprep.subr.bf16.mxu0 %v732_v0  ;;  %527 = vmatprep.subr.bf16.mxu1 %v732_v0  ;;  %v585_v13 = vld [vmem:[#allocation7 + $0x38] sm:$0xff]   ;;  %v586_v14 = vld [vmem:[#allocation8] sm:$0xff]   ;;  %v587_v15 = vld [vmem:[#allocation8 + $0x8] sm:$0xff]   ;;  %vm442_vm6 = vcmp.eq.s32.totalorder %v881_v50, 8  ;;  %vm447_vm7 = vcmp.eq.s32.totalorder %v881_v50, 9  ;;  %vm450_vm8 = vcmp.eq.s32.totalorder %v881_v50, 10 }
  0x4f   :  { %v588_v16 = vld [vmem:[#allocation8 + $0x10] sm:$0xff]   ;;  %v589_v17 = vld [vmem:[#allocation8 + $0x18] sm:$0xff]   ;;  %v590_v18 = vld [vmem:[#allocation8 + $0x20] sm:$0xff]  }
  0x50   :  { %v591_v19 = vld [vmem:[#allocation8 + $0x28] sm:$0xff]   ;;  %v474_v20 = vld [vmem:[%s923_s2] ss:$0 sm:$0xff]  ;;  %v592_v30 = vld [vmem:[#allocation8 + $0x30] sm:$0xff]  }
  0x51   :  { %520 = vmatpush3.bf16.msra.mxu0 %v577_v2  ;;  %528 = vmatpush3.bf16.msra.mxu1 %v579_v7  ;;  %v593_v31 = vld [vmem:[#allocation8 + $0x38] sm:$0xff]   ;;  %v478_v32 = vld [vmem:[%s925_s4] ss:$0 sm:$0xff]  ;;  %s734_s4 = smov [#allocation10]  }
  0x52   :  { %545 = vmatprep.subr.bf16.mxu0 %v732_v0  ;;  %529 = vmatprep.subr.bf16.mxu1 %v732_v0  ;;  %v487_v42 = vld [vmem:[%s927_s6] ss:$0 sm:$0xff]  ;;  %s460_s6 = sshll.u32 %s734_s4, 4  ;;  %s461_s6 = int_to_ptr.vmem [resolvable:$true] %s460_s6 }
  0x53   :  { %s694_s9 = scalar_lea.vmem %s461_s6, 256  ;;  %p699_p5 = scmp.lt.s32.totalorder %s461_s6, %s461_s6 }
  0x54   :  { %522 = vmatmul.mubr.msk.bf16.vlgmr.msra.gmra.mrb[0].mxu0 %vm109_vm1, %v85_v6  ;;  %p695_p4 = scmp.ne.s32.totalorder %s461_s6, %s694_s9  ;;  %p700_p6 = scmp.lt.s32.totalorder %s694_s9, %s694_s9 }
  0x55   :  { %561 = vmatprep.mubr.msk.bf16.mxu0 %vm733_vm0, %v732_v0  ;;  %530 = vmatpush3.bf16.msra.mxu1 %v580_v8 }
  0x56   :  { %531 = vmatprep.subr.bf16.mxu1 %v732_v0  ;;  %546 = vmatpush3.bf16.msra.mxu0 %v586_v14  ;;  %p701_p7 = por %p700_p6, %p699_p5 }
  0x57   :  { %547 = vmatprep.subr.bf16.mxu0 %v732_v0 }
  0x58   :  { %p702_p8 = pnand %p701_p7, %p695_p4 }
  0x59   :  { %532 = vmatpush3.bf16.msra.mxu1 %v581_v9 }
  0x5a   :  { %533 = vmatprep.subr.bf16.mxu1 %v732_v0  ;;  %548 = vmatpush3.bf16.msra.mxu0 %v587_v15 }
  0x5b   :  { %549 = vmatprep.subr.bf16.mxu0 %v732_v0 }
  0x5d   :  { %534 = vmatpush3.bf16.msra.mxu1 %v582_v10 }
  0x5e   :  { %535 = vmatprep.subr.bf16.mxu1 %v732_v0  ;;  %550 = vmatpush3.bf16.msra.mxu0 %v588_v16 }
  0x5f   :  { %551 = vmatprep.subr.bf16.mxu0 %v732_v0 }
  0x61   :  { %536 = vmatpush3.bf16.msra.mxu1 %v583_v11 }
  0x62   :  { %537 = vmatprep.subr.bf16.mxu1 %v732_v0  ;;  %552 = vmatpush3.bf16.msra.mxu0 %v589_v17 }
  0x63   :  { %553 = vmatprep.subr.bf16.mxu0 %v732_v0 }
  0x65   :  { %538 = vmatpush3.bf16.msra.mxu1 %v584_v12 }
  0x66   :  { %539 = vmatprep.subr.bf16.mxu1 %v732_v0  ;;  %554 = vmatpush3.bf16.msra.mxu0 %v590_v18 }
  0x67   :  { %555 = vmatprep.subr.bf16.mxu0 %v732_v0 }
  0x69   :  { %540 = vmatpush3.bf16.msra.mxu1 %v585_v13 }
  0x6a   :  { %556 = vmatpush3.bf16.msra.mxu0 %v591_v19 }
  0x6b   :  { %557 = vmatprep.subr.bf16.mxu0 %v732_v0 }
  0x6e   :  { %558 = vmatpush3.bf16.msra.mxu0 %v592_v30 }
  0x6f   :  { %559 = vmatprep.subr.bf16.mxu0 %v732_v0 }
  0x72   :  { %560 = vmatpush3.bf16.msra.mxu0 %v593_v31 }
 0x127   :  { %v147_v21 = vpop.f32.mrb[0].mxu0 }
 0x128   :  { %v148_v22 = vadd.f32 %v474_v20, %v147_v21  ;;  %v523_v23 = vpop.f32.mrb[1].mxu0 }
 0x129   :  { %v150_v24 = vpop.f32.mrb[2].mxu0 }
 0x12a   :  { %v151_v25 = vadd.f32 %v474_v20, %v150_v24  ;;  %v524_v26 = vpop.f32.mrb[3].mxu0  ;;  %v154_v27 = vmax.f32 %v148_v22, 0.0 }
 0x12c   :  { %v155_v28 = vmax.f32 %v151_v25, 0.0 }
 0x12e   :  { %v156_v29 = vpack.c.bf16 %v155_v28, %v154_v27 }
 0x130   :  { %542 = vmatmul.mubr.bf16.vlgmr.msra.gmra.mrb[0].mxu1 %v156_v29 }
 0x203   :  { %v262_v33 = vpop.f32.mrb[0].mxu1 }
 0x204   :  { %v263_v34 = vadd.f32 %v478_v32, %v262_v33  ;;  %v543_v35 = vpop.f32.mrb[1].mxu1 }
 0x205   :  { %v265_v36 = vpop.f32.mrb[2].mxu1 }
 0x206   :  { %v266_v37 = vadd.f32 %v478_v32, %v265_v36  ;;  %v544_v38 = vpop.f32.mrb[3].mxu1  ;;  %v269_v39 = vmax.f32 %v263_v34, 0.0 }
 0x208   :  { %v270_v40 = vmax.f32 %v266_v37, 0.0 }
 0x20a   :  { %v271_v41 = vpack.c.bf16 %v270_v40, %v269_v39 }
 0x20c   :  { %562 = vmatmul.mubr.bf16.vlgmr.msra.gmra.mrb[4].mxu0 %v271_v41 }
 0x2df   :  { %v377_v43 = vpop.f32.mrb[4].mxu0 }
 0x2e0   :  { %v875_v44 = vadd.f32 %v487_v42, %v377_v43  ;;  %v563_v45 = vpop.f32.mrb[5].mxu0 }
 0x2e1   :  { %v380_v46 = vpop.f32.mrb[6].mxu0 }
 0x2e2   :  { %384 = vmax.xlane.f32.xlu0 %v875_v44  ;;  %v564_v47 = vpop.f32.mrb[7].mxu0  ;;  %v878_v48 = vadd.f32 %v487_v42, %v380_v46 }
 0x2e6   :  { %386 = vmax.xlane.f32.xlu0 %v878_v48 }
 0x36f   :  { %v385_v51 = vpop.xlane.xlu0 %384 }
 0x370   :  { %v388_v52 = vsub.f32 %v875_v44, %v385_v51  ;;  %vm410_vm2 = vcmp.ge.f32.partialorder %v875_v44, %v385_v51 }
 0x371   :  { %v412_v53 = vsel %vm410_vm2, %v881_v50, 128 }
 0x372   :  { %v390_v54 = vmul.f32 1.442695, %v388_v52  ;;  %v415_v55 = vshra.s32 %v412_v53, 16  ;;  %v414_v1 = vand.u32 65535, %v412_v53 }
 0x373   :  { %v387_v56 = vpop.xlane.xlu0 %386 }
 0x374   :  { %594 = vpow2.f32 %v390_v54  ;;  %v389_v57 = vsub.f32 %v878_v48, %v387_v56  ;;  %vm411_vm3 = vcmp.ge.f32.partialorder %v878_v48, %v387_v56  ;;  %v417_v58 = vcvt.s32.f32 %v415_v55 }
 0x375   :  { %v413_v59 = vsel %vm411_vm3, %v881_v50, 128  ;;  %v416_v3 = vcvt.s32.f32 %v414_v1 }
 0x376   :  { %v392_v60 = vmul.f32 1.442695, %v389_v57  ;;  %418 = vmin.xlane.f32.xlu1 %v417_v58  ;;  %v429_v61 = vshra.s32 %v413_v59, 16  ;;  %v428_v4 = vand.u32 65535, %v413_v59 }
 0x378   :  { %596 = vpow2.f32 %v392_v60  ;;  %v431_v62 = vcvt.s32.f32 %v429_v61  ;;  %v430_v7 = vcvt.s32.f32 %v428_v4 }
 0x37a   :  { %432 = vmin.xlane.f32.xlu1 %v431_v62 }
 0x37e   :  { %v595_v63 = vpop.eup %594 }
 0x37f   :  { %394 = vadd.xlane.f32.xlu0 %v595_v63 }
 0x382   :  { %v597_v0 = vpop.eup %596 }
 0x383   :  { %396 = vadd.xlane.f32.xlu1 %v597_v0 }
 0x403   :  { %v419_v2 = vpop.xlane.xlu1 %418 }
 0x404   :  { %vm420_vm4 = vcmp.eq.f32.partialorder %v417_v58, %v419_v2  ;;  %v425_v11 = vcvt.f32.s32 %v419_v2 }
 0x405   :  { %v421_v5 = vsel %vm420_vm4, %v416_v3, inf }
 0x406   :  { %422 = vmin.xlane.f32.xlu0 %v421_v5  ;;  %v426_v14 = vshll.u32 %v425_v11, 16 }
 0x407   :  { %v433_v6 = vpop.xlane.xlu1 %432 }
 0x408   :  { %vm434_vm5 = vcmp.eq.f32.partialorder %v431_v62, %v433_v6  ;;  %v439_v15 = vcvt.f32.s32 %v433_v6 }
 0x409   :  { %v435_v8 = vsel %vm434_vm5, %v430_v7, inf }
 0x40a   :  { %436 = vmin.xlane.f32.xlu1 %v435_v8  ;;  %v440_v22 = vshll.u32 %v439_v15, 16 }
 0x40c   :  { %v395_v9 = vpop.xlane.xlu0 %394 }
 0x40d   :  { %598 = vlog2.f32 %v395_v9 }
 0x40e   :  { %600 = vrcp.f32 %v395_v9 }
 0x410   :  { %v397_v10 = vpop.xlane.xlu1 %396 }
 0x411   :  { %602 = vlog2.f32 %v397_v10 }
 0x412   :  { %604 = vrcp.f32 %v397_v10 }
 0x417   :  { %v599_v12 = vpop.eup %598 }
 0x418   :  { %v601_v17 = vpop.eup %600  ;;  %v403_v18 = vmul.f32 0.6931472, %v599_v12 }
 0x419   :  { %v400_v25 = vadd.f32 1e-07, %v601_v17 }
 0x41a   :  { %v406_v27 = vsub.f32 2e-07, %v403_v18 }
 0x41b   :  { %v603_v20 = vpop.eup %602 }
 0x41c   :  { %v605_v26 = vpop.eup %604  ;;  %v405_v28 = vmul.f32 0.6931472, %v603_v20 }
 0x41d   :  { %v401_v34 = vadd.f32 1e-07, %v605_v26 }
 0x41e   :  { %v407_v35 = vsub.f32 2e-07, %v405_v28 }
 0x493   :  { %v423_v13 = vpop.xlane.xlu0 %422 }
 0x494   :  { %v424_v16 = vcvt.f32.s32 %v423_v13 }
 0x496   :  { %v427_v19 = vadd.s32 %v426_v14, %v424_v16 }
 0x497   :  { %v437_v21 = vpop.xlane.xlu1 %436 }
 0x498   :  { %v443_v23 = vcvt.s32.f32 %v427_v19  ;;  %v438_v24 = vcvt.f32.s32 %v437_v21 }
 0x49a   :  { %v445_v29 = vsel %vm442_vm6, %v443_v23, %v875_v44  ;;  %v441_v30 = vadd.s32 %v440_v22, %v438_v24 }
 0x49b   :  { %v448_v31 = vsel %vm447_vm7, %v400_v25, %v445_v29 }
 0x49c   :  { %v444_v32 = vcvt.s32.f32 %v441_v30  ;;  %v451_v33 = vsel %vm450_vm8, %v406_v27, %v448_v31 }
 0x49d   :  { %453 = vst [vmem:[#allocation10] sm:$0xff] %v451_v33 }
 0x49e   :  { %v446_v36 = vsel %vm442_vm6, %v444_v32, %v878_v48 }
 0x49f   :  { %v449_v37 = vsel %vm447_vm7, %v401_v34, %v446_v36 }
 0x4a0   :  { %v452_v38 = vsel %vm450_vm8, %v407_v35, %v449_v37 }
 0x4a1   :  { %454 = vst [vmem:[#allocation10 + $0x8] sm:$0xff] %v452_v38 }
 0x4a2   :  { %705 = shalt.err (!%p702_p8)
}
 0x4a3   :  { %s706_s14 = scalar_lea.hbm %s928_s7, 256 }
 0x4a4   :  { %p707_p9 = scmp.ne.s32.totalorder %s928_s7, %s706_s14  ;;  %p710_p10 = scmp.lt.u32.totalorder %s706_s14, %s928_s7 }
 0x4a6   :  { %p712_p11 = pnand %p710_p10, %p707_p9 }
 0x4a8   :  { %715 = shalt.err (!%p712_p11)
}
 0x4a9   :  { %466 = dma.vmem_to_hbm [thread:$0]  %s461_s6, 256, %s928_s7, [#allocation4], %s728_s1, %s728_s1, %s729_s25  }
 0x4aa   :  { %722 = dma.done.wait [#allocation4], 256  }
 0x4ab   :  { %723 = vsyncadd [#allocation4], 4294967040 }
 0x4ac   :  { %470 = vsyncpa [#allocation3], 1 }
 0x4ad   :  { %471 = vsyncpa [#allocation6], 1 }
 0x4ae   :  { %472 = vsyncpa [#allocation9], 1 }
 0x4af   :  { %473 = vsyncpa [#allocation4], 1 }

// kernel: tpu_custom_call.1
= control target key start
LH: loop header
LB: loop body
LE: loop exit
PB: predicated region body
PF: predicated region fallthrough
CT: control target
= control target key end

     0   :  { %12 = vsyncpa [#allocation3], 0  ;;  %s921_s0 = inlined_call_operand.hbm [shape: f32[16,32], index: 0, kind: input, shape index: {}]   ;;  %s922_s1 = inlined_call_operand.hbm [shape: bf16[32,128], index: 1, kind: input, shape index: {}]   ;;  %s923_s2 = inlined_call_operand.vmem [shape: f32[1,128], index: 2, kind: input, shape index: {}]   ;;  %s924_s3 = inlined_call_operand.hbm [shape: bf16[128,128], index: 3, kind: input, shape index: {}]   ;;  %s925_s4 = inlined_call_operand.vmem [shape: f32[1,128], index: 4, kind: input, shape index: {}]   ;;  %s926_s5 = inlined_call_operand.hbm [shape: bf16[128,128], index: 5, kind: input, shape index: {}]   ;;  %s927_s6 = inlined_call_operand.vmem [shape: f32[1,128], index: 6, kind: input, shape index: {}]   ;;  %s928_s7 = inlined_call_operand.hbm [shape: f32[16,128], index: 7, kind: output, shape index: {}]  }
   0x1   :  { %13 = vsyncpa [#allocation6], 0 }
   0x2   :  { %14 = vsyncpa [#allocation9], 0 }
   0x3   :  { %15 = vsyncpa [#allocation4], 0  ;;  %s724_s24 = smov [#allocation5]   ;;  %s606_s28 = scalar_lea.hbm %s922_s1, 256 }
   0x4   :  { %s33_s25 = sshll.u32 %s724_s24, 4  ;;  %p607_p0 = scmp.ne.s32.totalorder %s922_s1, %s606_s28  ;;  %s34_s25 = int_to_ptr.vmem [resolvable:$true] %s33_s25 }
   0x5   :  { %p610_p1 = scmp.lt.u32.totalorder %s606_s28, %s922_s1 }
   0x7   :  { %p612_p2 = pnand %p610_p1, %p607_p0 }
   0x9   :  { %615 = shalt.err (!%p612_p2)
}
   0xa   :  { %s616_s10 = scalar_lea.vmem %s34_s25, 256  ;;  %p621_p4 = scmp.lt.s32.totalorder %s34_s25, %s34_s25 }
   0xb   :  { %p617_p3 = scmp.ne.s32.totalorder %s34_s25, %s616_s10  ;;  %p622_p5 = scmp.lt.s32.totalorder %s616_s10, %s616_s10 }
   0xd   :  { %p623_p6 = por %p622_p5, %p621_p4 }
   0xf   :  { %p624_p7 = pnand %p623_p6, %p617_p3 }
  0x11   :  { %627 = shalt.err (!%p624_p7)
}
  0x12   :  { %s725_s11 = smov 64   ;;  %s726_s12 = smov 4  }
  0x13   :  { %39 = dma.hbm_to_vmem [thread:$0]  %s922_s1, 256, %s34_s25, [#allocation6], %s725_s11, %s725_s11, %s726_s12  }
  0x14   :  { %s727_s15 = smov [#allocation2]   ;;  %s628_s19 = scalar_lea.hbm %s921_s0, 256 }
  0x15   :  { %s21_s16 = sshll.u32 %s727_s15, 4  ;;  %p629_p8 = scmp.ne.s32.totalorder %s921_s0, %s628_s19  ;;  %s22_s16 = int_to_ptr.vmem [resolvable:$true] %s21_s16 }
  0x16   :  { %p632_p9 = scmp.lt.u32.totalorder %s628_s19, %s921_s0 }
  0x18   :  { %p634_p10 = pnand %p632_p9, %p629_p8 }
  0x1a   :  { %637 = shalt.err (!%p634_p10)
}
  0x1b   :  { %s638_s24 = scalar_lea.vmem %s22_s16, 256  ;;  %p643_p12 = scmp.lt.s32.totalorder %s22_s16, %s22_s16 }
  0x1c   :  { %p639_p11 = scmp.ne.s32.totalorder %s22_s16, %s638_s24  ;;  %p644_p13 = scmp.lt.s32.totalorder %s638_s24, %s638_s24 }
  0x1e   :  { %p645_p0 = por %p644_p13, %p643_p12 }
  0x20   :  { %p646_p1 = pnand %p645_p0, %p639_p11 }
  0x22   :  { %649 = shalt.err (!%p646_p1)
}
  0x23   :  { %s728_s1 = smov 128   ;;  %s729_s25 = smov 8  }
  0x24   :  { %27 = dma.hbm_to_vmem [thread:$0]  %s921_s0, 256, %s22_s16, [#allocation3], %s728_s1, %s728_s1, %s729_s25  }
  0x25   :  { %s730_s28 = smov [#allocation7]   ;;  %s731_s30 = smov [#allocation8]  }
  0x26   :  { %s47_s29 = sshll.u32 %s730_s28, 4  ;;  %s61_s8 = sshll.u32 %s731_s30, 4  ;;  %s48_s29 = int_to_ptr.vmem [resolvable:$true] %s47_s29  ;;  %s805_s8 = int_to_ptr.vmem [resolvable:$true] %s61_s8 }
  0x27   :  { %s650_s13 = scalar_lea.hbm %s924_s3, 1024 }
  0x28   :  { %p651_p2 = scmp.ne.s32.totalorder %s924_s3, %s650_s13  ;;  %p654_p3 = scmp.lt.u32.totalorder %s650_s13, %s924_s3 }
  0x2a   :  { %p656_p4 = pnand %p654_p3, %p651_p2 }
  0x2c   :  { %659 = shalt.err (!%p656_p4)
}
  0x2d   :  { %s660_s0 = scalar_lea.vmem %s48_s29, 1024  ;;  %p665_p6 = scmp.lt.s32.totalorder %s48_s29, %s48_s29 }
  0x2e   :  { %p661_p5 = scmp.ne.s32.totalorder %s48_s29, %s660_s0  ;;  %p666_p7 = scmp.lt.s32.totalorder %s660_s0, %s660_s0 }
  0x30   :  { %p667_p8 = por %p666_p7, %p665_p6 }
  0x32   :  { %p668_p9 = pnand %p667_p8, %p661_p5 }
  0x34   :  { %671 = shalt.err (!%p668_p9)
}
  0x35   :  { %53 = dma.hbm_to_vmem [thread:$0]  %s924_s3, 1024, %s48_s29, [#allocation6], %s725_s11, %s725_s11, %s726_s12  }
  0x36   :  { %s672_s22 = scalar_lea.hbm %s926_s5, 1024 }
  0x37   :  { %p673_p10 = scmp.ne.s32.totalorder %s926_s5, %s672_s22  ;;  %p676_p11 = scmp.lt.u32.totalorder %s672_s22, %s926_s5 }
  0x39   :  { %p678_p12 = pnand %p676_p11, %p673_p10 }
  0x3b   :  { %681 = shalt.err (!%p678_p12)
}
  0x3c   :  { %s682_s28 = scalar_lea.vmem %s805_s8, 1024  ;;  %p687_p0 = scmp.lt.s32.totalorder %s805_s8, %s805_s8 }
  0x3d   :  { %p683_p13 = scmp.ne.s32.totalorder %s805_s8, %s682_s28  ;;  %p688_p1 = scmp.lt.s32.totalorder %s682_s28, %s682_s28 }
  0x3f   :  { %p689_p2 = por %p688_p1, %p687_p0 }
  0x41   :  { %p690_p3 = pnand %p689_p2, %p683_p13 }
  0x43   :  { %693 = shalt.err (!%p690_p3)
}
  0x44   :  { %67 = dma.hbm_to_vmem [thread:$0]  %s926_s5, 1024, %s805_s8, [#allocation9], %s725_s11, %s725_s11, %s726_s12  }
  0x45   :  { %716 = dma.done.wait [#allocation3], 256  }
  0x46   :  { %717 = vsyncadd [#allocation3], 4294967040 }
  0x47   :  { %718 = dma.done.wait [#allocation6], 1280  }
  0x48   :  { %719 = vsyncadd [#allocation6], 4294966016 }
  0x49   :  { %720 = dma.done.wait [#allocation9], 1024  }
  0x4a   :  { %721 = vsyncadd [#allocation9], 4294966272  ;;  %v732_v0 = vmov 0.0   ;;  %vm733_vm0 = vmmov 0   ;;  %v576_v1 = vld [vmem:[#allocation5] sm:$0xff]   ;;  %v577_v2 = vld [vmem:[#allocation5 + $0x8] sm:$0xff]   ;;  %v408_v49 = vlaneseq }
  0x4b   :  { %517 = vmatprep.subr.bf16.mxu0 %v732_v0  ;;  %521 = vmatprep.mubr.msk.bf16.mxu0 %vm733_vm0, %v732_v0  ;;  %v83_v3 = vld [vmem:[#allocation2] sm:$0xff]  ;;  %v84_v4 = vld [vmem:[#allocation2 + $0x8] sm:$0xff]  ;;  %vm109_vm1 = vcmask 261120   ;;  %v580_v8 = vld [vmem:[#allocation7 + $0x10] sm:$0xff]  }
  0x4c   :  { %525 = vmatprep.subr.bf16.mxu1 %v732_v0  ;;  %541 = vmatprep.mubr.msk.bf16.mxu1 %vm733_vm0, %v732_v0  ;;  %v578_v5 = vld [vmem:[#allocation7] sm:$0xff]   ;;  %v85_v6 = vpack.c.bf16 %v84_v4, %v83_v3  ;;  %v579_v7 = vld [vmem:[#allocation7 + $0x8] sm:$0xff]   ;;  %v581_v9 = vld [vmem:[#allocation7 + $0x18] sm:$0xff]   ;;  %v881_v50 = vand.u32 127, %v408_v49 }
  0x4d   :  { %518 = vmatpush3.bf16.msra.mxu0 %v576_v1  ;;  %526 = vmatpush3.bf16.msra.mxu1 %v578_v5  ;;  %v582_v10 = vld [vmem:[#allocation7 + $0x20] sm:$0xff]   ;;  %v583_v11 = vld [vmem:[#allocation7 + $0x28] sm:$0xff]   ;;  %v584_v12 = vld [vmem:[#allocation7 + $0x30] sm:$0xff]  }
  0x4e   :  { %519 = vmatprep.subr.bf16.mxu0 %v732_v0  ;;  %527 = vmatprep.subr.bf16.mxu1 %v732_v0  ;;  %v585_v13 = vld [vmem:[#allocation7 + $0x38] sm:$0xff]   ;;  %v586_v14 = vld [vmem:[#allocation8] sm:$0xff]   ;;  %v587_v15 = vld [vmem:[#allocation8 + $0x8] sm:$0xff]   ;;  %vm442_vm6 = vcmp.eq.s32.totalorder %v881_v50, 8  ;;  %vm447_vm7 = vcmp.eq.s32.totalorder %v881_v50, 9  ;;  %vm450_vm8 = vcmp.eq.s32.totalorder %v881_v50, 10 }
  0x4f   :  { %v588_v16 = vld [vmem:[#allocation8 + $0x10] sm:$0xff]   ;;  %v589_v17 = vld [vmem:[#allocation8 + $0x18] sm:$0xff]   ;;  %v590_v18 = vld [vmem:[#allocation8 + $0x20] sm:$0xff]  }
  0x50   :  { %v591_v19 = vld [vmem:[#allocation8 + $0x28] sm:$0xff]   ;;  %v474_v20 = vld [vmem:[%s923_s2] ss:$0 sm:$0xff]  ;;  %v592_v30 = vld [vmem:[#allocation8 + $0x30] sm:$0xff]  }
  0x51   :  { %520 = vmatpush3.bf16.msra.mxu0 %v577_v2  ;;  %528 = vmatpush3.bf16.msra.mxu1 %v579_v7  ;;  %v593_v31 = vld [vmem:[#allocation8 + $0x38] sm:$0xff]   ;;  %v478_v32 = vld [vmem:[%s925_s4] ss:$0 sm:$0xff]  ;;  %s734_s4 = smov [#allocation10]  }
  0x52   :  { %545 = vmatprep.subr.bf16.mxu0 %v732_v0  ;;  %529 = vmatprep.subr.bf16.mxu1 %v732_v0  ;;  %v487_v42 = vld [vmem:[%s927_s6] ss:$0 sm:$0xff]  ;;  %s460_s6 = sshll.u32 %s734_s4, 4  ;;  %s461_s6 = int_to_ptr.vmem [resolvable:$true] %s460_s6 }
  0x53   :  { %s694_s9 = scalar_lea.vmem %s461_s6, 256  ;;  %p699_p5 = scmp.lt.s32.totalorder %s461_s6, %s461_s6 }
  0x54   :  { %522 = vmatmul.mubr.msk.bf16.vlgmr.msra.gmra.mrb[0].mxu0 %vm109_vm1, %v85_v6  ;;  %p695_p4 = scmp.ne.s32.totalorder %s461_s6, %s694_s9  ;;  %p700_p6 = scmp.lt.s32.totalorder %s694_s9, %s694_s9 }
  0x55   :  { %561 = vmatprep.mubr.msk.bf16.mxu0 %vm733_vm0, %v732_v0  ;;  %530 = vmatpush3.bf16.msra.mxu1 %v580_v8 }
  0x56   :  { %531 = vmatprep.subr.bf16.mxu1 %v732_v0  ;;  %546 = vmatpush3.bf16.msra.mxu0 %v586_v14  ;;  %p701_p7 = por %p700_p6, %p699_p5 }
  0x57   :  { %547 = vmatprep.subr.bf16.mxu0 %v732_v0 }
  0x58   :  { %p702_p8 = pnand %p701_p7, %p695_p4 }
  0x59   :  { %532 = vmatpush3.bf16.msra.mxu1 %v581_v9 }
  0x5a   :  { %533 = vmatprep.subr.bf16.mxu1 %v732_v0  ;;  %548 = vmatpush3.bf16.msra.mxu0 %v587_v15 }
  0x5b   :  { %549 = vmatprep.subr.bf16.mxu0 %v732_v0 }
  0x5d   :  { %534 = vmatpush3.bf16.msra.mxu1 %v582_v10 }
  0x5e   :  { %535 = vmatprep.subr.bf16.mxu1 %v732_v0  ;;  %550 = vmatpush3.bf16.msra.mxu0 %v588_v16 }
  0x5f   :  { %551 = vmatprep.subr.bf16.mxu0 %v732_v0 }
  0x61   :  { %536 = vmatpush3.bf16.msra.mxu1 %v583_v11 }
  0x62   :  { %537 = vmatprep.subr.bf16.mxu1 %v732_v0  ;;  %552 = vmatpush3.bf16.msra.mxu0 %v589_v17 }
  0x63   :  { %553 = vmatprep.subr.bf16.mxu0 %v732_v0 }
  0x65   :  { %538 = vmatpush3.bf16.msra.mxu1 %v584_v12 }
  0x66   :  { %539 = vmatprep.subr.bf16.mxu1 %v732_v0  ;;  %554 = vmatpush3.bf16.msra.mxu0 %v590_v18 }
  0x67   :  { %555 = vmatprep.subr.bf16.mxu0 %v732_v0 }
  0x69   :  { %540 = vmatpush3.bf16.msra.mxu1 %v585_v13 }
  0x6a   :  { %556 = vmatpush3.bf16.msra.mxu0 %v591_v19 }
  0x6b   :  { %557 = vmatprep.subr.bf16.mxu0 %v732_v0 }
  0x6e   :  { %558 = vmatpush3.bf16.msra.mxu0 %v592_v30 }
  0x6f   :  { %559 = vmatprep.subr.bf16.mxu0 %v732_v0 }
  0x72   :  { %560 = vmatpush3.bf16.msra.mxu0 %v593_v31 }
 0x127   :  { %v147_v21 = vpop.f32.mrb[0].mxu0 }
 0x128   :  { %v148_v22 = vadd.f32 %v474_v20, %v147_v21  ;;  %v523_v23 = vpop.f32.mrb[1].mxu0 }
 0x129   :  { %v150_v24 = vpop.f32.mrb[2].mxu0 }
 0x12a   :  { %v151_v25 = vadd.f32 %v474_v20, %v150_v24  ;;  %v524_v26 = vpop.f32.mrb[3].mxu0  ;;  %v154_v27 = vmax.f32 %v148_v22, 0.0 }
 0x12c   :  { %v155_v28 = vmax.f32 %v151_v25, 0.0 }
 0x12e   :  { %v156_v29 = vpack.c.bf16 %v155_v28, %v154_v27 }
 0x130   :  { %542 = vmatmul.mubr.bf16.vlgmr.msra.gmra.mrb[0].mxu1 %v156_v29 }
 0x203   :  { %v262_v33 = vpop.f32.mrb[0].mxu1 }
 0x204   :  { %v263_v34 = vadd.f32 %v478_v32, %v262_v33  ;;  %v543_v35 = vpop.f32.mrb[1].mxu1 }
 0x205   :  { %v265_v36 = vpop.f32.mrb[2].mxu1 }
 0x206   :  { %v266_v37 = vadd.f32 %v478_v32, %v265_v36  ;;  %v544_v38 = vpop.f32.mrb[3].mxu1  ;;  %v269_v39 = vmax.f32 %v263_v34, 0.0 }
 0x208   :  { %v270_v40 = vmax.f32 %v266_v37, 0.0 }
 0x20a   :  { %v271_v41 = vpack.c.bf16 %v270_v40, %v269_v39 }
 0x20c   :  { %562 = vmatmul.mubr.bf16.vlgmr.msra.gmra.mrb[4].mxu0 %v271_v41 }
 0x2df   :  { %v377_v43 = vpop.f32.mrb[4].mxu0 }
 0x2e0   :  { %v875_v44 = vadd.f32 %v487_v42, %v377_v43  ;;  %v563_v45 = vpop.f32.mrb[5].mxu0 }
 0x2e1   :  { %v380_v46 = vpop.f32.mrb[6].mxu0 }
 0x2e2   :  { %384 = vmax.xlane.f32.xlu0 %v875_v44  ;;  %v564_v47 = vpop.f32.mrb[7].mxu0  ;;  %v878_v48 = vadd.f32 %v487_v42, %v380_v46 }
 0x2e6   :  { %386 = vmax.xlane.f32.xlu0 %v878_v48 }
 0x36f   :  { %v385_v51 = vpop.xlane.xlu0 %384 }
 0x370   :  { %v388_v52 = vsub.f32 %v875_v44, %v385_v51  ;;  %vm410_vm2 = vcmp.ge.f32.partialorder %v875_v44, %v385_v51 }
 0x371   :  { %v412_v53 = vsel %vm410_vm2, %v881_v50, 128 }
 0x372   :  { %v390_v54 = vmul.f32 1.442695, %v388_v52  ;;  %v415_v55 = vshra.s32 %v412_v53, 16  ;;  %v414_v1 = vand.u32 65535, %v412_v53 }
 0x373   :  { %v387_v56 = vpop.xlane.xlu0 %386 }
 0x374   :  { %594 = vpow2.f32 %v390_v54  ;;  %v389_v57 = vsub.f32 %v878_v48, %v387_v56  ;;  %vm411_vm3 = vcmp.ge.f32.partialorder %v878_v48, %v387_v56  ;;  %v417_v58 = vcvt.s32.f32 %v415_v55 }
 0x375   :  { %v413_v59 = vsel %vm411_vm3, %v881_v50, 128  ;;  %v416_v3 = vcvt.s32.f32 %v414_v1 }
 0x376   :  { %v392_v60 = vmul.f32 1.442695, %v389_v57  ;;  %418 = vmin.xlane.f32.xlu1 %v417_v58  ;;  %v429_v61 = vshra.s32 %v413_v59, 16  ;;  %v428_v4 = vand.u32 65535, %v413_v59 }
 0x378   :  { %596 = vpow2.f32 %v392_v60  ;;  %v431_v62 = vcvt.s32.f32 %v429_v61  ;;  %v430_v7 = vcvt.s32.f32 %v428_v4 }
 0x37a   :  { %432 = vmin.xlane.f32.xlu1 %v431_v62 }
 0x37e   :  { %v595_v63 = vpop.eup %594 }
 0x37f   :  { %394 = vadd.xlane.f32.xlu0 %v595_v63 }
 0x382   :  { %v597_v0 = vpop.eup %596 }
 0x383   :  { %396 = vadd.xlane.f32.xlu1 %v597_v0 }
 0x403   :  { %v419_v2 = vpop.xlane.xlu1 %418 }
 0x404   :  { %vm420_vm4 = vcmp.eq.f32.partialorder %v417_v58, %v419_v2  ;;  %v425_v11 = vcvt.f32.s32 %v419_v2 }
 0x405   :  { %v421_v5 = vsel %vm420_vm4, %v416_v3, inf }
 0x406   :  { %422 = vmin.xlane.f32.xlu0 %v421_v5  ;;  %v426_v14 = vshll.u32 %v425_v11, 16 }
 0x407   :  { %v433_v6 = vpop.xlane.xlu1 %432 }
 0x408   :  { %vm434_vm5 = vcmp.eq.f32.partialorder %v431_v62, %v433_v6  ;;  %v439_v15 = vcvt.f32.s32 %v433_v6 }
 0x409   :  { %v435_v8 = vsel %vm434_vm5, %v430_v7, inf }
 0x40a   :  { %436 = vmin.xlane.f32.xlu1 %v435_v8  ;;  %v440_v22 = vshll.u32 %v439_v15, 16 }
 0x40c   :  { %v395_v9 = vpop.xlane.xlu0 %394 }
 0x40d   :  { %598 = vlog2.f32 %v395_v9 }
 0x40e   :  { %600 = vrcp.f32 %v395_v9 }
 0x410   :  { %v397_v10 = vpop.xlane.xlu1 %396 }
 0x411   :  { %602 = vlog2.f32 %v397_v10 }
 0x412   :  { %604 = vrcp.f32 %v397_v10 }
 0x417   :  { %v599_v12 = vpop.eup %598 }
 0x418   :  { %v601_v17 = vpop.eup %600  ;;  %v403_v18 = vmul.f32 0.6931472, %v599_v12 }
 0x419   :  { %v400_v25 = vadd.f32 1e-07, %v601_v17 }
 0x41a   :  { %v406_v27 = vsub.f32 2e-07, %v403_v18 }
 0x41b   :  { %v603_v20 = vpop.eup %602 }
 0x41c   :  { %v605_v26 = vpop.eup %604  ;;  %v405_v28 = vmul.f32 0.6931472, %v603_v20 }
 0x41d   :  { %v401_v34 = vadd.f32 1e-07, %v605_v26 }
 0x41e   :  { %v407_v35 = vsub.f32 2e-07, %v405_v28 }
 0x493   :  { %v423_v13 = vpop.xlane.xlu0 %422 }
 0x494   :  { %v424_v16 = vcvt.f32.s32 %v423_v13 }
 0x496   :  { %v427_v19 = vadd.s32 %v426_v14, %v424_v16 }
 0x497   :  { %v437_v21 = vpop.xlane.xlu1 %436 }
 0x498   :  { %v443_v23 = vcvt.s32.f32 %v427_v19  ;;  %v438_v24 = vcvt.f32.s32 %v437_v21 }
 0x49a   :  { %v445_v29 = vsel %vm442_vm6, %v443_v23, %v875_v44  ;;  %v441_v30 = vadd.s32 %v440_v22, %v438_v24 }
 0x49b   :  { %v448_v31 = vsel %vm447_vm7, %v400_v25, %v445_v29 }
 0x49c   :  { %v444_v32 = vcvt.s32.f32 %v441_v30  ;;  %v451_v33 = vsel %vm450_vm8, %v406_v27, %v448_v31 }
 0x49d   :  { %453 = vst [vmem:[#allocation10] sm:$0xff] %v451_v33 }
 0x49e   :  { %v446_v36 = vsel %vm442_vm6, %v444_v32, %v878_v48 }
 0x49f   :  { %v449_v37 = vsel %vm447_vm7, %v401_v34, %v446_v36 }
 0x4a0   :  { %v452_v38 = vsel %vm450_vm8, %v407_v35, %v449_v37 }
 0x4a1   :  { %454 = vst [vmem:[#allocation10 + $0x8] sm:$0xff] %v452_v38 }
 0x4a2   :  { %705 = shalt.err (!%p702_p8)
}
 0x4a3   :  { %s706_s14 = scalar_lea.hbm %s928_s7, 256 }
 0x4a4   :  { %p707_p9 = scmp.ne.s32.totalorder %s928_s7, %s706_s14  ;;  %p710_p10 = scmp.lt.u32.totalorder %s706_s14, %s928_s7 }
 0x4a6   :  { %p712_p11 = pnand %p710_p10, %p707_p9 }
 0x4a8   :  { %715 = shalt.err (!%p712_p11)
}
 0x4a9   :  { %466 = dma.vmem_to_hbm [thread:$0]  %s461_s6, 256, %s928_s7, [#allocation4], %s728_s1, %s728_s1, %s729_s25  }
 0x4aa   :  { %722 = dma.done.wait [#allocation4], 256  }
 0x4ab   :  { %723 = vsyncadd [#allocation4], 4294967040 }
 0x4ac   :  { %470 = vsyncpa [#allocation3], 1 }
 0x4ad   :  { %471 = vsyncpa [#allocation6], 1 }
 0x4ae   :  { %472 = vsyncpa [#allocation9], 1 }
 0x4af   :  { %473 = vsyncpa [#allocation4], 1 }

</bundles_post_ra>
